<compile_context>
chip_gen: v7x
topology: tpu7x:2x2x1
jax: 0.10.0
libtpu: 0.0.40
codegen_flags: <defaults>
</compile_context>

<pallas_src>
import functools

import jax
import jax.numpy as jnp
from jax.experimental import pallas as pl
from jax.experimental.pallas import tpu as pltpu

ORIGINAL_SIZE = 768
NEW_SIZE = 64


def _network_kernel(x_ref, w1_ref, b1_ref, w2_ref, b2_ref, o_ref):
    # fc1: (tb, 768) bf16 @ (768, 64) bf16 -> f32 accumulation on the MXU
    h = jnp.dot(x_ref[...], w1_ref[...], preferred_element_type=jnp.float32)
    h = h + b1_ref[...]

    # Softmax over last dim (torch.nn.Softmax() on 2-D input -> dim=1), f32.
    m = jnp.max(h, axis=-1, keepdims=True)
    e = jnp.exp(h - m)
    denom = jnp.sum(e, axis=-1, keepdims=True)
    p = e * pl.reciprocal(denom, approx=True)  # EUP vrcp slot, nearly free

    # fc2: (tb, 64) @ (64, 64) + (1, 64), f32
    out = jnp.dot(p, w2_ref[...], preferred_element_type=jnp.float32)
    out = out + b2_ref[...]
    o_ref[...] = out.astype(o_ref.dtype)


def _round_up(x, m):
    return ((x + m - 1) // m) * m


def _default_block_b(B):
    if B <= 8:
        return 8
    # Big tiles amortize the ~0.35 us per-grid-step overhead (roofline), but
    # keep >= 2 grid steps so the "parallel" axis can shard across v7x's two
    # TensorCores.  Cap at 512 rows (well within scoped VMEM on v5e/v6e/v7x).
    half = _round_up(pl.cdiv(B, 2), 8)
    return min(512, half)


@functools.partial(jax.jit, static_argnames=("block_b",))
def _network_forward_padded(x_pad, w1, b1, w2, b2, *, block_b):
    Bp, F_in = x_pad.shape
    F_mid = w1.shape[1]
    F_out = w2.shape[1]

    grid = (Bp // block_b,)
    flops = 2 * Bp * F_in * F_mid + 2 * Bp * F_mid * F_out
    bytes_accessed = (
        Bp * F_in * x_pad.dtype.itemsize      # x (bf16)
        + Bp * F_out * 4                      # output (f32)
        + F_in * F_mid * w1.dtype.itemsize    # W1 (bf16)
        + F_mid * F_out * 4                   # W2 (f32)
        + (F_mid + F_out) * 4                 # biases
    )

    return pl.pallas_call(
        _network_kernel,
        out_shape=jax.ShapeDtypeStruct((Bp, F_out), jnp.float32),
        grid_spec=pltpu.PrefetchScalarGridSpec(
            num_scalar_prefetch=0,
            grid=grid,
            in_specs=[
                pl.BlockSpec((block_b, F_in), lambda i: (i, 0)),   # x tile
                pl.BlockSpec((F_in, F_mid), lambda i: (0, 0)),     # W1 (resident)
                pl.BlockSpec((1, F_mid), lambda i: (0, 0)),        # b1
                pl.BlockSpec((F_mid, F_out), lambda i: (0, 0)),    # W2 (resident)
                pl.BlockSpec((1, F_out), lambda i: (0, 0)),        # b2
            ],
            out_specs=pl.BlockSpec((block_b, F_out), lambda i: (i, 0)),
        ),
        compiler_params=pltpu.CompilerParams(
            dimension_semantics=("parallel",),
            vmem_limit_bytes=32 * 1024 * 1024,
        ),
        cost_estimate=pl.CostEstimate(
            flops=flops,
            transcendentals=Bp * F_mid,  # exp in the softmax
            bytes_accessed=bytes_accessed,
        ),
    )(x_pad, w1, b1, w2, b2)


def network_forward(x, w1, b1, w2, b2, *, block_b=None):
    """Fused fc1 -> softmax -> fc2 forward pass for any batch size.

    x: (B, 768).  Weights stored pre-transposed as (in_features, out_features).
    x and W1 are fed to the kernel as bf16 (the kernel is HBM-read bound on x);
    accumulation / softmax / fc2 are f32.
    """
    B = x.shape[0]
    if block_b is None:
        block_b = _default_block_b(B)

    x_bf = x.astype(jnp.bfloat16)
    w1_bf = w1.astype(jnp.bfloat16)

    Bp = _round_up(B, block_b)
    if Bp != B:
        x_bf = jnp.pad(x_bf, ((0, Bp - B), (0, 0)))  # padded rows sliced off below

    out = _network_forward_padded(x_bf, w1_bf, b1, w2, b2, block_b=block_b)
    return out[:B]


def init_params(key):
    """Deterministic PyTorch-style init: U(-1/sqrt(fan_in), 1/sqrt(fan_in))."""
    k1, k2, k3, k4 = jax.random.split(key, 4)
    bound1 = 1.0 / jnp.sqrt(ORIGINAL_SIZE)
    bound2 = 1.0 / jnp.sqrt(NEW_SIZE)
    # stored pre-transposed: (in_features, out_features)
    w1 = jax.random.uniform(k1, (ORIGINAL_SIZE, NEW_SIZE), jnp.float32,
                            -bound1, bound1)
    b1 = jax.random.uniform(k2, (1, NEW_SIZE), jnp.float32, -bound1, bound1)
    w2 = jax.random.uniform(k3, (NEW_SIZE, NEW_SIZE), jnp.float32,
                            -bound2, bound2)
    b2 = jax.random.uniform(k4, (1, NEW_SIZE), jnp.float32, -bound2, bound2)
    return w1, b1, w2, b2


if __name__ == "__main__":
    key = jax.random.PRNGKey(0)
    kx, kp = jax.random.split(key)
    w1, b1, w2, b2 = init_params(kp)

    def reference_forward(x):
        # Reference uses the same bf16-rounded x / W1 the kernel sees, so the
        # comparison isolates kernel correctness (accumulation is f32 in both).
        xb = x.astype(jnp.bfloat16).astype(jnp.float32)
        w1b = w1.astype(jnp.bfloat16).astype(jnp.float32)
        h = xb @ w1b + b1
        p = jax.nn.softmax(h, axis=-1)
        return p @ w2 + b2

    # B=8: single tile.  B=20: exercises the padding path and a 2-step grid.
    for B in (8, 20):
        x = jax.random.normal(jax.random.fold_in(kx, B),
                              (B, ORIGINAL_SIZE), jnp.float32)
        out = jax.block_until_ready(network_forward(x, w1, b1, w2, b2))
        ref = reference_forward(x)
        assert out.shape == (B, NEW_SIZE)
        assert jnp.allclose(out, ref, atol=5e-3, rtol=5e-3), "mismatch vs reference"

    print("KERNEL_OK")
</pallas_src>

<mosaic_0001>
module attributes {stable_mosaic.version = 11 : i64} {
  func.func @_network_kernel(%arg0: i32, %arg1: memref<8x768xbf16, #tpu.memory_space<vmem>>, %arg2: memref<768x64xbf16, #tpu.memory_space<vmem>>, %arg3: memref<1x64xf32, #tpu.memory_space<vmem>>, %arg4: memref<64x64xf32, #tpu.memory_space<vmem>>, %arg5: memref<1x64xf32, #tpu.memory_space<vmem>>, %arg6: memref<8x64xf32, #tpu.memory_space<vmem>>) attributes {dimension_semantics = [#tpu.dimension_semantics<parallel>], iteration_bounds = array<i64: 1>, scalar_prefetch = 0 : i64, scratch_operands = 0 : i64, tpu.core_type = #tpu.core_type<tc>, window_params = [{transform_indices = @transform_0, window_bounds = array<i64: 8, 768>}, {pipeline_mode = #tpu.pipeline_mode<synchronous>, transform_indices = @transform_1, window_bounds = array<i64: 768, 64>}, {pipeline_mode = #tpu.pipeline_mode<synchronous>, transform_indices = @transform_2, window_bounds = array<i64: 1, 64>}, {pipeline_mode = #tpu.pipeline_mode<synchronous>, transform_indices = @transform_3, window_bounds = array<i64: 64, 64>}, {pipeline_mode = #tpu.pipeline_mode<synchronous>, transform_indices = @transform_4, window_bounds = array<i64: 1, 64>}, {transform_indices = @transform_5, window_bounds = array<i64: 8, 64>}]} {
    %c0 = arith.constant 0 : index
    %c0_0 = arith.constant 0 : index
    %0 = vector.load %arg1[%c0, %c0_0] : memref<8x768xbf16, #tpu.memory_space<vmem>>, vector<8x768xbf16>
    %c0_1 = arith.constant 0 : index
    %c0_2 = arith.constant 0 : index
    %1 = vector.load %arg2[%c0_1, %c0_2] : memref<768x64xbf16, #tpu.memory_space<vmem>>, vector<768x64xbf16>
    %cst = arith.constant dense<0.000000e+00> : vector<8x64xf32>
    %2 = tpu.matmul %0, %1, %cst {dimension_numbers = #tpu.dot_dimension_numbers<[1], [0], [0], [1], [0, 0, 1, 1], [], []>} : vector<8x768xbf16>, vector<768x64xbf16>, vector<8x64xf32> -> vector<8x64xf32>
    %c0_3 = arith.constant 0 : index
    %c0_4 = arith.constant 0 : index
    %3 = vector.load %arg3[%c0_3, %c0_4] : memref<1x64xf32, #tpu.memory_space<vmem>>, vector<1x64xf32>
    %4 = vector.broadcast %3 : vector<1x64xf32> to vector<8x64xf32>
    %5 = arith.addf %2, %4 : vector<8x64xf32>
    %cst_5 = arith.constant dense<0xFF800000> : vector<8xf32>
    %6 = vector.multi_reduction <maximumf>, %5, %cst_5 [1] : vector<8x64xf32> to vector<8xf32>
    %7 = vector.shape_cast %6 : vector<8xf32> to vector<8x1xf32>
    %8 = vector.broadcast %7 : vector<8x1xf32> to vector<8x64xf32>
    %9 = arith.subf %5, %8 : vector<8x64xf32>
    %10 = math.exp %9 : vector<8x64xf32>
    %cst_6 = arith.constant dense<0.000000e+00> : vector<8xf32>
    %11 = vector.multi_reduction <add>, %10, %cst_6 [1] : vector<8x64xf32> to vector<8xf32>
    %12 = vector.shape_cast %11 : vector<8xf32> to vector<8x1xf32>
    %13 = tpu.reciprocal %12 {approx = true} : vector<8x1xf32> -> vector<8x1xf32>
    %14 = vector.broadcast %13 : vector<8x1xf32> to vector<8x64xf32>
    %15 = arith.mulf %10, %14 : vector<8x64xf32>
    %c0_7 = arith.constant 0 : index
    %c0_8 = arith.constant 0 : index
    %16 = vector.load %arg4[%c0_7, %c0_8] : memref<64x64xf32, #tpu.memory_space<vmem>>, vector<64x64xf32>
    %cst_9 = arith.constant dense<0.000000e+00> : vector<8x64xf32>
    %17 = tpu.matmul %15, %16, %cst_9 {dimension_numbers = #tpu.dot_dimension_numbers<[1], [0], [0], [1], [0, 0, 1, 1], [], []>} : vector<8x64xf32>, vector<64x64xf32>, vector<8x64xf32> -> vector<8x64xf32>
    %c0_10 = arith.constant 0 : index
    %c0_11 = arith.constant 0 : index
    %18 = vector.load %arg5[%c0_10, %c0_11] : memref<1x64xf32, #tpu.memory_space<vmem>>, vector<1x64xf32>
    %19 = vector.broadcast %18 : vector<1x64xf32> to vector<8x64xf32>
    %20 = arith.addf %17, %19 : vector<8x64xf32>
    %c0_12 = arith.constant 0 : index
    %c0_13 = arith.constant 0 : index
    %21 = vector.load %arg6[%c0_12, %c0_13] : memref<8x64xf32, #tpu.memory_space<vmem>>, vector<8x64xf32>
    tpu.vector_store %arg6[%c0_12, %c0_13], %20 {strides = array<i32>} : memref<8x64xf32, #tpu.memory_space<vmem>>, vector<8x64xf32>,
    return
  }
  func.func @transform_0(%arg0: i32) -> (i32, i32) {
    %c0_i32 = arith.constant 0 : i32
    %c0_i32_0 = arith.constant 0 : i32
    return %arg0, %c0_i32 : i32, i32
  }
  func.func @transform_1(%arg0: i32) -> (i32, i32) {
    %c0_i32 = arith.constant 0 : i32
    %c0_i32_0 = arith.constant 0 : i32
    %c0_i32_1 = arith.constant 0 : i32
    return %c0_i32, %c0_i32_0 : i32, i32
  }
  func.func @transform_2(%arg0: i32) -> (i32, i32) {
    %c0_i32 = arith.constant 0 : i32
    %c0_i32_0 = arith.constant 0 : i32
    %c0_i32_1 = arith.constant 0 : i32
    return %c0_i32, %c0_i32_0 : i32, i32
  }
  func.func @transform_3(%arg0: i32) -> (i32, i32) {
    %c0_i32 = arith.constant 0 : i32
    %c0_i32_0 = arith.constant 0 : i32
    %c0_i32_1 = arith.constant 0 : i32
    return %c0_i32, %c0_i32_0 : i32, i32
  }
  func.func @transform_4(%arg0: i32) -> (i32, i32) {
    %c0_i32 = arith.constant 0 : i32
    %c0_i32_0 = arith.constant 0 : i32
    %c0_i32_1 = arith.constant 0 : i32
    return %c0_i32, %c0_i32_0 : i32, i32
  }
  func.func @transform_5(%arg0: i32) -> (i32, i32) {
    %c0_i32 = arith.constant 0 : i32
    %c0_i32_0 = arith.constant 0 : i32
    return %arg0, %c0_i32 : i32, i32
  }
}

</mosaic_0001>

<bundles_post_ra>
// kernel: _network_forward_padded.1
= control target key start
LH: loop header
LB: loop body
LE: loop exit
PB: predicated region body
PF: predicated region fallthrough
CT: control target
= control target key end

     0   :  { %s1154_s0 = inlined_call_operand.vmem [shape: bf16[8,768], index: 0, kind: input, shape index: {}]   ;;  %s1155_s1 = inlined_call_operand.vmem [shape: bf16[768,64], index: 1, kind: input, shape index: {}]   ;;  %s1156_s2 = inlined_call_operand.vmem [shape: f32[1,64], index: 2, kind: input, shape index: {}]   ;;  %s1157_s3 = inlined_call_operand.vmem [shape: f32[64,64], index: 3, kind: input, shape index: {}]   ;;  %s1158_s4 = inlined_call_operand.vmem [shape: f32[1,64], index: 4, kind: input, shape index: {}]   ;;  %s1159_s5 = inlined_call_operand.hbm [shape: f32[8,64], index: 5, kind: output, shape index: {}]  }
   0x1   :  { %v839_v0 = vld [vmem:[%s1155_s1 + $0x40] sm:$0xff]   ;;  %v843_v4 = vld [vmem:[%s1155_s1 + $0x48] sm:$0xff]   ;;  %v847_v8 = vld [vmem:[%s1155_s1 + $0x50] sm:$0xff]  }
   0x2   :  { %v840_v1 = vld [vmem:[%s1155_s1] sm:$0xff]   ;;  %729 = vmatprep.subr.bf16.mxu0 %v839_v0  ;;  %v844_v5 = vld [vmem:[%s1155_s1 + $0x8] sm:$0xff]   ;;  %v848_v9 = vld [vmem:[%s1155_s1 + $0x10] sm:$0xff]  }
   0x3   :  { %v841_v2 = vld [vmem:[%s1155_s1 + $0xc0] sm:$0xff]   ;;  %730 = vmatpush3.bf16.msra.mxu0 %v840_v1  ;;  %v845_v6 = vld [vmem:[%s1155_s1 + $0xc8] sm:$0xff]   ;;  %v849_v10 = vld [vmem:[%s1155_s1 + $0xd0] sm:$0xff]  }
   0x4   :  { %v842_v3 = vld [vmem:[%s1155_s1 + $0x80] sm:$0xff]   ;;  %751 = vmatprep.subr.bf16.mxu1 %v841_v2  ;;  %731 = vmatprep.subr.bf16.mxu0 %v843_v4  ;;  %v846_v7 = vld [vmem:[%s1155_s1 + $0x88] sm:$0xff]   ;;  %v850_v11 = vld [vmem:[%s1155_s1 + $0x90] sm:$0xff]  }
   0x5   :  { %752 = vmatpush3.bf16.msra.mxu1 %v842_v3  ;;  %v851_v12 = vld [vmem:[%s1155_s1 + $0x58] sm:$0xff]   ;;  %v855_v16 = vld [vmem:[%s1155_s1 + $0x60] sm:$0xff]   ;;  %v859_v20 = vld [vmem:[%s1155_s1 + $0x68] sm:$0xff]  }
   0x6   :  { %753 = vmatprep.subr.bf16.mxu1 %v845_v6  ;;  %v852_v13 = vld [vmem:[%s1155_s1 + $0x18] sm:$0xff]   ;;  %v856_v17 = vld [vmem:[%s1155_s1 + $0x20] sm:$0xff]   ;;  %v860_v21 = vld [vmem:[%s1155_s1 + $0x28] sm:$0xff]  }
   0x7   :  { %732 = vmatpush3.bf16.msra.mxu0 %v844_v5  ;;  %v853_v14 = vld [vmem:[%s1155_s1 + $0xd8] sm:$0xff]   ;;  %v857_v18 = vld [vmem:[%s1155_s1 + $0xe0] sm:$0xff]   ;;  %v861_v22 = vld [vmem:[%s1155_s1 + $0xe8] sm:$0xff]  }
   0x8   :  { %733 = vmatprep.subr.bf16.mxu0 %v847_v8  ;;  %v854_v15 = vld [vmem:[%s1155_s1 + $0x98] sm:$0xff]   ;;  %v858_v19 = vld [vmem:[%s1155_s1 + $0xa0] sm:$0xff]   ;;  %v862_v23 = vld [vmem:[%s1155_s1 + $0xa8] sm:$0xff]  }
   0x9   :  { %754 = vmatpush3.bf16.msra.mxu1 %v846_v7  ;;  %v863_v24 = vld [vmem:[%s1155_s1 + $0x70] sm:$0xff]   ;;  %v867_v28 = vld [vmem:[%s1155_s1 + $0x78] sm:$0xff]   ;;  %v22_v31 = vld [vmem:[%s1154_s0] sm:$0xff] }
   0xa   :  { %755 = vmatprep.subr.bf16.mxu1 %v849_v10  ;;  %v864_v25 = vld [vmem:[%s1155_s1 + $0x30] sm:$0xff]   ;;  %v868_v29 = vld [vmem:[%s1155_s1 + $0x38] sm:$0xff]   ;;  %v673_v32 = vcombine.low %v22_v31, %v22_v31  ;;  %v674_v33 = vcombine.high %v22_v31, %v22_v31  ;;  %v873_v35 = vld [vmem:[%s1155_s1 + $0x140] sm:$0xff]  }
   0xb   :  { %734 = vmatpush3.bf16.msra.mxu0 %v848_v9  ;;  %v865_v26 = vld [vmem:[%s1155_s1 + $0xf0] sm:$0xff]   ;;  %v869_v30 = vld [vmem:[%s1155_s1 + $0xf8] sm:$0xff]   ;;  %v23_v36 = vld [vmem:[%s1154_s0 + $0x8] sm:$0xff] }
   0xc   :  { %735 = vmatprep.subr.bf16.mxu0 %v851_v12  ;;  %v866_v27 = vld [vmem:[%s1155_s1 + $0xb0] sm:$0xff]   ;;  %v872_v34 = vld [vmem:[%s1155_s1 + $0xb8] sm:$0xff]   ;;  %469 = vmatprep.mubr.bf16.mxu0 %v674_v33  ;;  %v675_v37 = vcombine.low %v23_v36, %v23_v36  ;;  %v676_v38 = vcombine.high %v23_v36, %v23_v36  ;;  %v876_v39 = vld [vmem:[%s1155_s1 + $0x100] sm:$0xff]  }
   0xd   :  { %756 = vmatpush3.bf16.msra.mxu1 %v850_v11  ;;  %v877_v40 = vld [vmem:[%s1155_s1 + $0x148] sm:$0xff]   ;;  %v879_v42 = vld [vmem:[%s1155_s1 + $0x150] sm:$0xff]   ;;  %v881_v44 = vld [vmem:[%s1155_s1 + $0x158] sm:$0xff]  }
   0xe   :  { %757 = vmatprep.subr.bf16.mxu1 %v853_v14  ;;  %509 = vmatprep.mubr.bf16.mxu1 %v676_v38  ;;  %v878_v41 = vld [vmem:[%s1155_s1 + $0x108] sm:$0xff]   ;;  %v880_v43 = vld [vmem:[%s1155_s1 + $0x110] sm:$0xff]   ;;  %v882_v45 = vld [vmem:[%s1155_s1 + $0x118] sm:$0xff]  }
   0xf   :  { %736 = vmatpush3.bf16.msra.mxu0 %v852_v13  ;;  %v883_v46 = vld [vmem:[%s1155_s1 + $0x160] sm:$0xff]   ;;  %v24_v48 = vld [vmem:[%s1154_s0 + $0x10] sm:$0xff]  ;;  %v885_v49 = vld [vmem:[%s1155_s1 + $0x168] sm:$0xff]  }
  0x10   :  { %737 = vmatprep.subr.bf16.mxu0 %v855_v16  ;;  %v884_v47 = vld [vmem:[%s1155_s1 + $0x120] sm:$0xff]   ;;  %v678_v50 = vcombine.high %v24_v48, %v24_v48 }
  0x11   :  { %758 = vmatpush3.bf16.msra.mxu1 %v854_v15 }
  0x12   :  { %759 = vmatprep.subr.bf16.mxu1 %v857_v18 }
  0x13   :  { %738 = vmatpush3.bf16.msra.mxu0 %v856_v17 }
  0x14   :  { %739 = vmatprep.subr.bf16.mxu0 %v859_v20 }
  0x15   :  { %760 = vmatpush3.bf16.msra.mxu1 %v858_v19 }
  0x16   :  { %761 = vmatprep.subr.bf16.mxu1 %v861_v22 }
  0x17   :  { %740 = vmatpush3.bf16.msra.mxu0 %v860_v21 }
  0x18   :  { %741 = vmatprep.subr.bf16.mxu0 %v863_v24 }
  0x19   :  { %762 = vmatpush3.bf16.msra.mxu1 %v862_v23 }
  0x1a   :  { %763 = vmatprep.subr.bf16.mxu1 %v865_v26 }
  0x1b   :  { %742 = vmatpush3.bf16.msra.mxu0 %v864_v25 }
  0x1c   :  { %743 = vmatprep.subr.bf16.mxu0 %v867_v28 }
  0x1d   :  { %764 = vmatpush3.bf16.msra.mxu1 %v866_v27 }
  0x1e   :  { %765 = vmatprep.subr.bf16.mxu1 %v869_v30 }
  0x1f   :  { %744 = vmatpush3.bf16.msra.mxu0 %v868_v29 }
  0x20   :  { %773 = vmatprep.subr.bf16.mxu0 %v873_v35 }
  0x21   :  { %766 = vmatpush3.bf16.msra.mxu1 %v872_v34 }
  0x22   :  { %470 = vmatmul.mubr.bf16.vlgmr.msra.gmra.mrb[0].mxu0 %v673_v32 }
  0x23   :  { %774 = vmatpush3.bf16.msra.mxu0 %v876_v39 }
  0x24   :  { %510 = vmatmul.mubr.bf16.vlgmr.msra.gmra.mrb[0].mxu1 %v675_v37  ;;  %775 = vmatprep.subr.bf16.mxu0 %v877_v40 }
  0x27   :  { %776 = vmatpush3.bf16.msra.mxu0 %v878_v41 }
  0x28   :  { %777 = vmatprep.subr.bf16.mxu0 %v879_v42 }
  0x2b   :  { %778 = vmatpush3.bf16.msra.mxu0 %v880_v43 }
  0x2c   :  { %779 = vmatprep.subr.bf16.mxu0 %v881_v44 }
  0x2f   :  { %780 = vmatpush3.bf16.msra.mxu0 %v882_v45 }
  0x30   :  { %781 = vmatprep.subr.bf16.mxu0 %v883_v46 }
  0x31   :  { %10 = vsyncpa [#allocation3], 0  ;;  %549 = vmatprep.mubr.bf16.mxu0 %v678_v50  ;;  %v886_v51 = vld [vmem:[%s1155_s1 + $0x128] sm:$0xff]   ;;  %v887_v52 = vld [vmem:[%s1155_s1 + $0x170] sm:$0xff]   ;;  %v677_v56 = vcombine.low %v24_v48, %v24_v48  ;;  %vm557_vm0 = vcmask 523264   ;;  %v921_v15 = vmov 0.0|0.0  }
  0x32   :  { %v888_v53 = vld [vmem:[%s1155_s1 + $0x130] sm:$0xff]   ;;  %v889_v54 = vld [vmem:[%s1155_s1 + $0x178] sm:$0xff]   ;;  %v672_v58 = vld [vmem:[%s1156_s2] ss:$0 sm:$0xff]  ;;  %823 = vmatprep.subr.bf16.mxu1 %v921_v15  ;;  %vm922_vm1 = vmmov 0   ;;  %v923_v31 = vmov 0.0  }
  0x33   :  { %782 = vmatpush3.bf16.msra.mxu0 %v884_v47  ;;  %v890_v55 = vld [vmem:[%s1155_s1 + $0x138] sm:$0xff]   ;;  %v569_v13 = vld [vmem:[%s1157_s3] sm:$0xff]  ;;  %v570_v14 = vld [vmem:[%s1157_s3 + $0x8] sm:$0xff]  ;;  %820 = vmatprep.mubr.msk.f32.mxu1 %vm922_vm1, %v923_v31  ;;  %s924_s12 = smov [#allocation2]  }
  0x34   :  { %783 = vmatprep.subr.bf16.mxu0 %v885_v49  ;;  %v824_v16 = vpack.c.bf16 %v570_v14, %v569_v13  ;;  %v571_v22 = vld [vmem:[%s1157_s3 + $0x10] sm:$0xff]  ;;  %v572_v23 = vld [vmem:[%s1157_s3 + $0x18] sm:$0xff]  ;;  %v573_v25 = vld [vmem:[%s1157_s3 + $0x20] sm:$0xff]  ;;  %s664_s13 = sshll.u32 %s924_s12, 4  ;;  %s665_s13 = int_to_ptr.vmem [resolvable:$true] %s664_s13 }
  0x35   :  { %v827_v24 = vpack.c.bf16 %v572_v23, %v571_v22  ;;  %v574_v26 = vld [vmem:[%s1157_s3 + $0x28] sm:$0xff]  ;;  %v575_v28 = vld [vmem:[%s1157_s3 + $0x30] sm:$0xff]  ;;  %v576_v29 = vld [vmem:[%s1157_s3 + $0x38] sm:$0xff]  ;;  %s897_s3 = scalar_lea.vmem %s665_s13, 128  ;;  %p902_p1 = scmp.lt.s32.totalorder %s665_s13, %s665_s13 }
  0x36   :  { %825 = vmatpush3.bf16.msra.mxu1 %v824_v16  ;;  %v830_v27 = vpack.c.bf16 %v574_v26, %v573_v25  ;;  %v833_v30 = vpack.c.bf16 %v576_v29, %v575_v28  ;;  %v727_v35 = vld [vmem:[%s1158_s4] ss:$0 sm:$0xff]  ;;  %p898_p0 = scmp.ne.s32.totalorder %s665_s13, %s897_s3  ;;  %p903_p2 = scmp.lt.s32.totalorder %s897_s3, %s897_s3 }
  0x37   :  { %784 = vmatpush3.bf16.msra.mxu0 %v886_v51  ;;  %826 = vmatprep.subr.bf16.mxu1 %v921_v15 }
  0x38   :  { %785 = vmatprep.subr.bf16.mxu0 %v887_v52  ;;  %p904_p3 = por %p903_p2, %p902_p1 }
  0x3a   :  { %828 = vmatpush3.bf16.msra.mxu1 %v827_v24  ;;  %p905_p4 = pnand %p904_p3, %p898_p0 }
  0x3b   :  { %786 = vmatpush3.bf16.msra.mxu0 %v888_v53  ;;  %829 = vmatprep.subr.bf16.mxu1 %v921_v15 }
  0x3c   :  { %787 = vmatprep.subr.bf16.mxu0 %v889_v54 }
  0x3e   :  { %831 = vmatpush3.bf16.msra.mxu1 %v830_v27 }
  0x3f   :  { %788 = vmatpush3.bf16.msra.mxu0 %v890_v55  ;;  %832 = vmatprep.subr.bf16.mxu1 %v921_v15 }
  0x42   :  { %550 = vmatmul.mubr.bf16.vlgmr.msra.gmra.mrb[4].mxu0 %v677_v56  ;;  %834 = vmatpush3.bf16.msra.mxu1 %v833_v30 }
  0xf5   :  { %v745_v57 = vpop.f32.mrb[0].mxu0 }
  0xf6   :  { %v746_v59 = vpop.f32.mrb[1].mxu0 }
  0xf7   :  { %v747_v60 = vadd.f32 %v746_v59, %v745_v57  ;;  %v748_v61 = vpop.f32.mrb[2].mxu0  ;;  %v767_v62 = vpop.f32.mrb[0].mxu1 }
  0xf8   :  { %v749_v63 = vpop.f32.mrb[3].mxu0  ;;  %v768_v0 = vpop.f32.mrb[1].mxu1 }
  0xf9   :  { %v472_v1 = vadd.f32 %v747_v60, %v672_v58  ;;  %v769_v2 = vadd.f32 %v768_v0, %v767_v62  ;;  %v770_v3 = vpop.f32.mrb[2].mxu1 }
  0xfa   :  { %v771_v4 = vpop.f32.mrb[3].mxu1 }
  0xfb   :  { %v512_v5 = vadd.f32 %v769_v2, %v472_v1 }
 0x115   :  { %v789_v6 = vpop.f32.mrb[4].mxu0 }
 0x116   :  { %v790_v7 = vpop.f32.mrb[5].mxu0 }
 0x117   :  { %v791_v8 = vadd.f32 %v790_v7, %v789_v6  ;;  %v792_v9 = vpop.f32.mrb[6].mxu0 }
 0x118   :  { %v793_v10 = vpop.f32.mrb[7].mxu0 }
 0x119   :  { %v552_v11 = vadd.f32 %v791_v8, %v512_v5 }
 0x11b   :  { %v558_v12 = vsel %vm557_vm0, %v552_v11, -inf }
 0x11c   :  { %559 = vmax.xlane.f32.xlu0 %v558_v12 }
 0x1a9   :  { %v560_v17 = vpop.xlane.xlu0 %559 }
 0x1aa   :  { %v561_v18 = vsub.f32 %v552_v11, %v560_v17 }
 0x1ac   :  { %v562_v19 = vmul.f32 1.442695, %v561_v18 }
 0x1ae   :  { %893 = vpow2.f32 %v562_v19 }
 0x1b8   :  { %v894_v20 = vpop.eup %893 }
 0x1b9   :  { %v564_v21 = vsel %vm557_vm0, %v894_v20, 0.0 }
 0x1ba   :  { %565 = vadd.xlane.f32.xlu0 %v564_v21 }
 0x247   :  { %v566_v32 = vpop.xlane.xlu0 %565 }
 0x248   :  { %895 = vrcp.f32 %v566_v32 }
 0x252   :  { %v896_v33 = vpop.eup %895 }
 0x253   :  { %v568_v34 = vmul.f32 %v896_v33, %v894_v20 }
 0x255   :  { %821 = vmatmul.mubr.msk.f32.vlgmr.msra.gmra.mrb[4].mxu1 %vm557_vm0, %v568_v34 }
 0x328   :  { %v653_v36 = vpop.f32.mrb[4].mxu1 }
 0x329   :  { %v654_v37 = vadd.f32 %v727_v35, %v653_v36  ;;  %v822_v38 = vpop.f32.mrb[5].mxu1 }
 0x32b   :  { %657 = vst.msk [vmem:[#allocation2] sm:$0xff] %vm557_vm0, %v654_v37 }
 0x32c   :  { %908 = shalt.err (!%p905_p4)
}
 0x32d   :  { %s909_s15 = scalar_lea.hbm %s1159_s5, 128 }
 0x32e   :  { %p910_p5 = scmp.ne.s32.totalorder %s1159_s5, %s909_s15  ;;  %p913_p6 = scmp.lt.u32.totalorder %s909_s15, %s1159_s5 }
 0x330   :  { %p915_p7 = pnand %p913_p6, %p910_p5 }
 0x332   :  { %918 = shalt.err (!%p915_p7)
}
 0x333   :  { %667 = dma.vmem_to_hbm [thread:$0]  %s665_s13, 128, %s1159_s5, [#allocation3]  }
 0x334   :  { %919 = dma.done.wait [#allocation3], 128  }
 0x335   :  { %920 = vsyncadd [#allocation3], 4294967168 }
 0x336   :  { %671 = vsyncpa [#allocation3], 1 }

</bundles_post_ra>
